<compile_context>
chip_gen: v7x
topology: tpu7x:2x2x1
jax: 0.10.0
libtpu: 0.0.40
codegen_flags: <defaults>
</compile_context>

<pallas_src>
import functools

import numpy as np
import jax
import jax.numpy as jnp
from jax.experimental import pallas as pl
from jax.experimental.pallas import tpu as pltpu


def _make_idwt_weight() -> np.ndarray:
    """Exactly mirrors DWTInverse.__init__ (used only by the numpy reference)."""
    ll = np.array([[0.5, 0.5], [0.5, 0.5]])
    lh = np.array([[-0.5, -0.5], [0.5, 0.5]])
    hl = np.array([[-0.5, 0.5], [-0.5, 0.5]])
    hh = np.array([[0.5, -0.5], [-0.5, 0.5]])
    filts = np.stack(
        [ll[None, ::-1, ::-1], lh[None, ::-1, ::-1],
         hl[None, ::-1, ::-1], hh[None, ::-1, ::-1]], axis=0)          # (4, 1, 2, 2)
    return filts.astype(np.float32)


_UNROLL_LIMIT = 8


def _for(n, body):
    """Static unroll for short loops; rolled scf.for (bounded live set) otherwise."""
    if n <= _UNROLL_LIMIT:
        for i in range(n):
            body(i)
    else:
        pl.loop(0, n)(body)


def _hint(val, mult):
    """Alignment hint on dynamic offsets; passthrough for static python ints."""
    if isinstance(val, (int, np.integer)):
        return int(val)
    return pl.multiple_of(val, mult)


def _idwt_kernel(x_ref, y_ref, *, cg, n_chunks, twi, w):
    """Fused Haar IDWT + pixel shuffle for one (n, channel-group, H-tile) block.

    x_ref: (4*cg, th, W)   subband k of local output channel g lives at [4*g + k]
    y_ref: (cg, th, 4*W)   row-pair-flattened output:
                           column a*2W + 2j + b  <->  y[2i + a, 2j + b]
    """
    twod = 2 * twi
    # Folded interleave matrices (compile-time constants; 0.5 Haar scale baked in):
    #   A[j, 2j] = A[j, 2j+1] = 0.5        B[j, 2j] = 0.5,  B[j, 2j+1] = -0.5
    #   top = (x0+x1) @ A + (x2+x3) @ B    (rows 2i,   interleaved over b)
    #   bot = (x0-x1) @ A + (x2-x3) @ B    (rows 2i+1, interleaved over b)
    row = jax.lax.broadcasted_iota(jnp.int32, (twi, twod), 0)
    col = jax.lax.broadcasted_iota(jnp.int32, (twi, twod), 1)
    ev = col == 2 * row
    od = col == 2 * row + 1
    half = jnp.float32(0.5)
    a_mat = jnp.where(ev | od, half, 0.0).astype(jnp.float32)
    b_mat = (jnp.where(ev, half, 0.0) - jnp.where(od, half, 0.0)).astype(jnp.float32)

    def per_group(g):
        def per_chunk(c):
            cs = _hint(c * twi, twi)
            x0 = x_ref[4 * g + 0, :, pl.ds(cs, twi)].astype(jnp.float32)
            x1 = x_ref[4 * g + 1, :, pl.ds(cs, twi)].astype(jnp.float32)
            x2 = x_ref[4 * g + 2, :, pl.ds(cs, twi)].astype(jnp.float32)
            x3 = x_ref[4 * g + 3, :, pl.ds(cs, twi)].astype(jnp.float32)

            # Haar butterfly, first stage only (second stage folded into A/B).
            s01 = x0 + x1
            d01 = x0 - x1
            s23 = x2 + x3
            d23 = x2 - x3

            # Lane dilation on the otherwise-idle MXU; dots ordered so each RHS
            # (A, then B) is reused by two back-to-back matmuls.
            t_a = jnp.dot(s01, a_mat, preferred_element_type=jnp.float32)
            b_a = jnp.dot(d01, a_mat, preferred_element_type=jnp.float32)
            t_b = jnp.dot(s23, b_mat, preferred_element_type=jnp.float32)
            b_b = jnp.dot(d23, b_mat, preferred_element_type=jnp.float32)

            top = (t_a + t_b).astype(y_ref.dtype)     # output rows 2i
            bot = (b_a + b_b).astype(y_ref.dtype)     # output rows 2i+1

            # Row parities of an output row-pair are adjacent in the 4W layout.
            o_top = _hint(2 * (c * twi), twod)
            o_bot = _hint(2 * w + 2 * (c * twi), twod)
            y_ref[g, :, pl.ds(o_top, twod)] = top
            y_ref[g, :, pl.ds(o_bot, twod)] = bot

        _for(n_chunks, per_chunk)

    _for(cg, per_group)


def _vmem_capacity_bytes() -> int:
    try:
        return int(pltpu.get_tpu_info().vmem_capacity_bytes)
    except Exception:
        pass
    try:
        if "v7" in jax.devices()[0].device_kind.lower():
            return 64 << 20
    except Exception:
        pass
    return 128 << 20


def _choose_config(N, C, H, W, itemsize):
    """Pick lane-chunk, H-tile, channel-group sizes and the VMEM limit (static)."""
    vmem_cap = _vmem_capacity_bytes()
    if vmem_cap >= (100 << 20):          # v5e / v6e: 128 MiB physical VMEM
        e_cap = 512 * 1024               # elements per (cg, th, W) channel tile (~8 MiB/side f32)
        int_cap = 256 * 1024             # cap on th*twi (bounds per-chunk f32 intermediates)
        vmem_limit = 96 << 20
    else:                                # v7x: 64 MiB physical VMEM per TensorCore
        e_cap = 256 * 1024               # ~4 MiB/side f32
        int_cap = 128 * 1024
        vmem_limit = 48 << 20

    # Lane-interleave chunk width (contraction length of the dilation matmul).
    if W % 256 == 0:
        twi = 256                        # matches v6e/v7x 256-wide MXU contraction
    elif W % 128 == 0:
        twi = 128
    elif W <= 256:
        twi = W
    else:
        divs = [d for d in range(1, 257) if W % d == 0]
        pref = [d for d in divs if d % 64 == 0]
        if pref:
            twi = max(pref)              # keeps 2*twi store offsets lane-aligned
        elif max(divs) >= 32:
            twi = max(divs)
        elif W <= 1024:
            twi = W                      # one wide chunk beats tiny masked stores
        else:
            twi = max(divs)              # TODO(synk): pad W for huge prime widths
    n_chunks = W // twi

    # H tile: largest divisor of H (sublane-aligned, or H itself) under the caps.
    sub = 8 if itemsize >= 4 else (16 if itemsize == 2 else 32)
    th_cap = max(1, min(e_cap // W, int_cap // twi))
    if H <= th_cap:
        th = H
    else:
        cands = [t for t in range(th_cap, 0, -1) if H % t == 0 and t % sub == 0]
        th = cands[0] if cands else H    # TODO(synk): pad H when no aligned divisor fits and H*W is huge

    # Channel packing: bounded only by the element cap (no n_chunks coupling).
    cg_cap = max(1, e_cap // max(1, th * W))
    cg = 1
    for g in range(min(C, cg_cap), 0, -1):
        if C % g == 0:
            cg = g
            break

    return cg, th, twi, n_chunks, vmem_limit


def dwt_inverse(x: jnp.ndarray) -> jnp.ndarray:
    """Pallas implementation of DWTInverse.forward (fixed Haar filters)."""
    N, C4, H, W = x.shape
    assert C4 % 4 == 0, "input channels must be a multiple of 4"
    C = C4 // 4
    itemsize = jnp.dtype(x.dtype).itemsize
    cg, th, twi, n_chunks, vmem_limit = _choose_config(N, C, H, W, itemsize)

    kernel = functools.partial(_idwt_kernel, cg=cg, n_chunks=n_chunks, twi=twi, w=W)

    # Grid ordering: largest (preferably even) extent first so the v7x megacore
    # split across 2 TensorCores stays balanced; keep H innermost for sequential
    # HBM access.  All axes are independent -> "parallel".
    extents = {"n": N, "c": C // cg, "h": H // th}
    axes = ("n", "c", "h")
    lead = max(axes, key=lambda a: (extents[a] % 2 == 0 and extents[a] > 1, extents[a]))
    rest = sorted([a for a in axes if a != lead], key=lambda a: a == "h")
    order = (lead, *rest)
    pos = {a: i for i, a in enumerate(order)}
    grid = tuple(extents[a] for a in order)

    def _imap(*g):
        return (g[pos["n"]], g[pos["c"]], g[pos["h"]], 0)

    cost = pl.CostEstimate(
        flops=3 * N * C4 * H * W,
        transcendentals=0,
        bytes_accessed=2 * N * C4 * H * W * itemsize)

    y4 = pl.pallas_call(
        kernel,
        out_shape=jax.ShapeDtypeStruct((N, C, H, 4 * W), x.dtype),
        grid=grid,
        in_specs=[pl.BlockSpec((None, 4 * cg, th, W), _imap)],
        out_specs=pl.BlockSpec((None, cg, th, 4 * W), _imap),
        compiler_params=pltpu.CompilerParams(
            dimension_semantics=("parallel", "parallel", "parallel"),
            vmem_limit_bytes=vmem_limit),
        cost_estimate=cost,
    )(x)

    # (N, C, H, 4W) row-major is byte-identical to (N, C, 2H, 2W); free reshape.
    return y4.reshape(N, C, 2 * H, 2 * W)


def _reference_dwt_inverse(x: np.ndarray, weight: np.ndarray) -> np.ndarray:
    """Independent numpy reference: scatter definition of conv_transpose2d(stride=2, groups=C)."""
    N, C4, H, W = x.shape
    C = C4 // 4
    filters = np.concatenate([weight] * C, axis=0)                     # (4C, 1, 2, 2)
    y = np.zeros((N, C, 2 * H, 2 * W), dtype=np.float64)
    for g in range(C):
        for k in range(4):
            c = 4 * g + k
            for a in range(2):
                for b in range(2):
                    y[:, g, a::2, b::2] += x[:, c] * filters[c, 0, a, b]
    return y.astype(x.dtype)


if __name__ == "__main__":
    key = jax.random.PRNGKey(0)
    w_ref = _make_idwt_weight()
    test_shapes = [
        (2, 8, 16, 16),      # C=2 output channels -> output (2, 2, 32, 32)
        (1, 12, 16, 48),     # C=3, exercises channel packing cg=3 and W not a 128-multiple
    ]
    for i, (N, C4, H, W) in enumerate(test_shapes):
        k = jax.random.fold_in(key, i)
        x = jax.random.normal(k, (N, C4, H, W), dtype=jnp.float32)

        y = jax.block_until_ready(dwt_inverse(x))

        y_ref = _reference_dwt_inverse(np.asarray(x), w_ref)
        assert y.shape == (N, C4 // 4, 2 * H, 2 * W), y.shape
        np.testing.assert_allclose(np.asarray(y), y_ref, rtol=1e-5, atol=1e-5)
    print("KERNEL_OK")
</pallas_src>

<mosaic_0001>
module attributes {stable_mosaic.version = 11 : i64} {
  func.func @_idwt_kernel(%arg0: i32, %arg1: i32, %arg2: i32, %arg3: memref<1x8x16x16xf32, #tpu.memory_space<vmem>>, %arg4: memref<1x2x16x64xf32, #tpu.memory_space<vmem>>) attributes {dimension_semantics = [#tpu.dimension_semantics<parallel>, #tpu.dimension_semantics<parallel>, #tpu.dimension_semantics<parallel>], iteration_bounds = array<i64: 2, 1, 1>, scalar_prefetch = 0 : i64, scratch_operands = 0 : i64, tpu.core_type = #tpu.core_type<tc>, window_params = [{transform_indices = @transform_0, window_bounds = array<i64: 1, 8, 16, 16>}, {transform_indices = @transform_1, window_bounds = array<i64: 1, 2, 16, 64>}]} {
    %0 = tpu.iota {dimensions = array<i32: 0>} : vector<16x32xi32>
    %1 = tpu.iota {dimensions = array<i32: 1>} : vector<16x32xi32>
    %c2_i32 = arith.constant 2 : i32
    %2 = vector.broadcast %c2_i32 : i32 to vector<16x32xi32>
    %3 = arith.muli %2, %0 : vector<16x32xi32>
    %4 = arith.cmpi eq, %1, %3 : vector<16x32xi32>
    %c2_i32_0 = arith.constant 2 : i32
    %5 = vector.broadcast %c2_i32_0 : i32 to vector<16x32xi32>
    %6 = arith.muli %5, %0 : vector<16x32xi32>
    %c1_i32 = arith.constant 1 : i32
    %7 = vector.broadcast %c1_i32 : i32 to vector<16x32xi32>
    %8 = arith.addi %6, %7 : vector<16x32xi32>
    %9 = arith.cmpi eq, %1, %8 : vector<16x32xi32>
    %10 = arith.ori %4, %9 : vector<16x32xi1>
    %cst = arith.constant 5.000000e-01 : f32
    %cst_1 = arith.constant 0.000000e+00 : f32
    %11 = vector.broadcast %cst : f32 to vector<16x32xf32>
    %12 = vector.broadcast %cst_1 : f32 to vector<16x32xf32>
    %13 = arith.select %10, %11, %12 : vector<16x32xi1>, vector<16x32xf32>
    %cst_2 = arith.constant 5.000000e-01 : f32
    %cst_3 = arith.constant 0.000000e+00 : f32
    %14 = vector.broadcast %cst_2 : f32 to vector<16x32xf32>
    %15 = vector.broadcast %cst_3 : f32 to vector<16x32xf32>
    %16 = arith.select %4, %14, %15 : vector<16x32xi1>, vector<16x32xf32>
    %cst_4 = arith.constant 5.000000e-01 : f32
    %cst_5 = arith.constant 0.000000e+00 : f32
    %17 = vector.broadcast %cst_4 : f32 to vector<16x32xf32>
    %18 = vector.broadcast %cst_5 : f32 to vector<16x32xf32>
    %19 = arith.select %9, %17, %18 : vector<16x32xi1>, vector<16x32xf32>
    %20 = arith.subf %16, %19 : vector<16x32xf32>
    %c0 = arith.constant 0 : index
    %c0_6 = arith.constant 0 : index
    %c0_7 = arith.constant 0 : index
    %c0_8 = arith.constant 0 : index
    %21 = vector.load %arg3[%c0, %c0_6, %c0_7, %c0_8] : memref<1x8x16x16xf32, #tpu.memory_space<vmem>>, vector<1x1x16x16xf32>
    %22 = vector.shape_cast %21 : vector<1x1x16x16xf32> to vector<16x16xf32>
    %c0_9 = arith.constant 0 : index
    %c1 = arith.constant 1 : index
    %c0_10 = arith.constant 0 : index
    %c0_11 = arith.constant 0 : index
    %23 = vector.load %arg3[%c0_9, %c1, %c0_10, %c0_11] : memref<1x8x16x16xf32, #tpu.memory_space<vmem>>, vector<1x1x16x16xf32>
    %24 = vector.shape_cast %23 : vector<1x1x16x16xf32> to vector<16x16xf32>
    %c0_12 = arith.constant 0 : index
    %c2 = arith.constant 2 : index
    %c0_13 = arith.constant 0 : index
    %c0_14 = arith.constant 0 : index
    %25 = vector.load %arg3[%c0_12, %c2, %c0_13, %c0_14] : memref<1x8x16x16xf32, #tpu.memory_space<vmem>>, vector<1x1x16x16xf32>
    %26 = vector.shape_cast %25 : vector<1x1x16x16xf32> to vector<16x16xf32>
    %c0_15 = arith.constant 0 : index
    %c3 = arith.constant 3 : index
    %c0_16 = arith.constant 0 : index
    %c0_17 = arith.constant 0 : index
    %27 = vector.load %arg3[%c0_15, %c3, %c0_16, %c0_17] : memref<1x8x16x16xf32, #tpu.memory_space<vmem>>, vector<1x1x16x16xf32>
    %28 = vector.shape_cast %27 : vector<1x1x16x16xf32> to vector<16x16xf32>
    %29 = arith.addf %22, %24 : vector<16x16xf32>
    %30 = arith.subf %22, %24 : vector<16x16xf32>
    %31 = arith.addf %26, %28 : vector<16x16xf32>
    %32 = arith.subf %26, %28 : vector<16x16xf32>
    %cst_18 = arith.constant dense<0.000000e+00> : vector<16x32xf32>
    %33 = tpu.matmul %29, %13, %cst_18 {dimension_numbers = #tpu.dot_dimension_numbers<[1], [0], [0], [1], [0, 0, 1, 1], [], []>} : vector<16x16xf32>, vector<16x32xf32>, vector<16x32xf32> -> vector<16x32xf32>
    %cst_19 = arith.constant dense<0.000000e+00> : vector<16x32xf32>
    %34 = tpu.matmul %30, %13, %cst_19 {dimension_numbers = #tpu.dot_dimension_numbers<[1], [0], [0], [1], [0, 0, 1, 1], [], []>} : vector<16x16xf32>, vector<16x32xf32>, vector<16x32xf32> -> vector<16x32xf32>
    %cst_20 = arith.constant dense<0.000000e+00> : vector<16x32xf32>
    %35 = tpu.matmul %31, %20, %cst_20 {dimension_numbers = #tpu.dot_dimension_numbers<[1], [0], [0], [1], [0, 0, 1, 1], [], []>} : vector<16x16xf32>, vector<16x32xf32>, vector<16x32xf32> -> vector<16x32xf32>
    %cst_21 = arith.constant dense<0.000000e+00> : vector<16x32xf32>
    %36 = tpu.matmul %32, %20, %cst_21 {dimension_numbers = #tpu.dot_dimension_numbers<[1], [0], [0], [1], [0, 0, 1, 1], [], []>} : vector<16x16xf32>, vector<16x32xf32>, vector<16x32xf32> -> vector<16x32xf32>
    %37 = arith.addf %33, %35 : vector<16x32xf32>
    %38 = arith.addf %34, %36 : vector<16x32xf32>
    %c0_22 = arith.constant 0 : index
    %c0_23 = arith.constant 0 : index
    %c0_24 = arith.constant 0 : index
    %c0_25 = arith.constant 0 : index
    %39 = vector.load %arg4[%c0_22, %c0_23, %c0_24, %c0_25] : memref<1x2x16x64xf32, #tpu.memory_space<vmem>>, vector<1x1x16x32xf32>
    %40 = vector.shape_cast %39 : vector<1x1x16x32xf32> to vector<16x32xf32>
    %41 = vector.shape_cast %37 : vector<16x32xf32> to vector<1x1x16x32xf32>
    tpu.vector_store %arg4[%c0_22, %c0_23, %c0_24, %c0_25], %41 {strides = array<i32>} : memref<1x2x16x64xf32, #tpu.memory_space<vmem>>, vector<1x1x16x32xf32>,
    %c0_26 = arith.constant 0 : index
    %c0_27 = arith.constant 0 : index
    %c0_28 = arith.constant 0 : index
    %c32 = arith.constant 32 : index
    %42 = vector.load %arg4[%c0_26, %c0_27, %c0_28, %c32] : memref<1x2x16x64xf32, #tpu.memory_space<vmem>>, vector<1x1x16x32xf32>
    %43 = vector.shape_cast %42 : vector<1x1x16x32xf32> to vector<16x32xf32>
    %44 = vector.shape_cast %38 : vector<16x32xf32> to vector<1x1x16x32xf32>
    tpu.vector_store %arg4[%c0_26, %c0_27, %c0_28, %c32], %44 {strides = array<i32>} : memref<1x2x16x64xf32, #tpu.memory_space<vmem>>, vector<1x1x16x32xf32>,
    %c0_29 = arith.constant 0 : index
    %c4 = arith.constant 4 : index
    %c0_30 = arith.constant 0 : index
    %c0_31 = arith.constant 0 : index
    %45 = vector.load %arg3[%c0_29, %c4, %c0_30, %c0_31] : memref<1x8x16x16xf32, #tpu.memory_space<vmem>>, vector<1x1x16x16xf32>
    %46 = vector.shape_cast %45 : vector<1x1x16x16xf32> to vector<16x16xf32>
    %c0_32 = arith.constant 0 : index
    %c5 = arith.constant 5 : index
    %c0_33 = arith.constant 0 : index
    %c0_34 = arith.constant 0 : index
    %47 = vector.load %arg3[%c0_32, %c5, %c0_33, %c0_34] : memref<1x8x16x16xf32, #tpu.memory_space<vmem>>, vector<1x1x16x16xf32>
    %48 = vector.shape_cast %47 : vector<1x1x16x16xf32> to vector<16x16xf32>
    %c0_35 = arith.constant 0 : index
    %c6 = arith.constant 6 : index
    %c0_36 = arith.constant 0 : index
    %c0_37 = arith.constant 0 : index
    %49 = vector.load %arg3[%c0_35, %c6, %c0_36, %c0_37] : memref<1x8x16x16xf32, #tpu.memory_space<vmem>>, vector<1x1x16x16xf32>
    %50 = vector.shape_cast %49 : vector<1x1x16x16xf32> to vector<16x16xf32>
    %c0_38 = arith.constant 0 : index
    %c7 = arith.constant 7 : index
    %c0_39 = arith.constant 0 : index
    %c0_40 = arith.constant 0 : index
    %51 = vector.load %arg3[%c0_38, %c7, %c0_39, %c0_40] : memref<1x8x16x16xf32, #tpu.memory_space<vmem>>, vector<1x1x16x16xf32>
    %52 = vector.shape_cast %51 : vector<1x1x16x16xf32> to vector<16x16xf32>
    %53 = arith.addf %46, %48 : vector<16x16xf32>
    %54 = arith.subf %46, %48 : vector<16x16xf32>
    %55 = arith.addf %50, %52 : vector<16x16xf32>
    %56 = arith.subf %50, %52 : vector<16x16xf32>
    %cst_41 = arith.constant dense<0.000000e+00> : vector<16x32xf32>
    %57 = tpu.matmul %53, %13, %cst_41 {dimension_numbers = #tpu.dot_dimension_numbers<[1], [0], [0], [1], [0, 0, 1, 1], [], []>} : vector<16x16xf32>, vector<16x32xf32>, vector<16x32xf32> -> vector<16x32xf32>
    %cst_42 = arith.constant dense<0.000000e+00> : vector<16x32xf32>
    %58 = tpu.matmul %54, %13, %cst_42 {dimension_numbers = #tpu.dot_dimension_numbers<[1], [0], [0], [1], [0, 0, 1, 1], [], []>} : vector<16x16xf32>, vector<16x32xf32>, vector<16x32xf32> -> vector<16x32xf32>
    %cst_43 = arith.constant dense<0.000000e+00> : vector<16x32xf32>
    %59 = tpu.matmul %55, %20, %cst_43 {dimension_numbers = #tpu.dot_dimension_numbers<[1], [0], [0], [1], [0, 0, 1, 1], [], []>} : vector<16x16xf32>, vector<16x32xf32>, vector<16x32xf32> -> vector<16x32xf32>
    %cst_44 = arith.constant dense<0.000000e+00> : vector<16x32xf32>
    %60 = tpu.matmul %56, %20, %cst_44 {dimension_numbers = #tpu.dot_dimension_numbers<[1], [0], [0], [1], [0, 0, 1, 1], [], []>} : vector<16x16xf32>, vector<16x32xf32>, vector<16x32xf32> -> vector<16x32xf32>
    %61 = arith.addf %57, %59 : vector<16x32xf32>
    %62 = arith.addf %58, %60 : vector<16x32xf32>
    %c0_45 = arith.constant 0 : index
    %c1_46 = arith.constant 1 : index
    %c0_47 = arith.constant 0 : index
    %c0_48 = arith.constant 0 : index
    %63 = vector.load %arg4[%c0_45, %c1_46, %c0_47, %c0_48] : memref<1x2x16x64xf32, #tpu.memory_space<vmem>>, vector<1x1x16x32xf32>
    %64 = vector.shape_cast %63 : vector<1x1x16x32xf32> to vector<16x32xf32>
    %65 = vector.shape_cast %61 : vector<16x32xf32> to vector<1x1x16x32xf32>
    tpu.vector_store %arg4[%c0_45, %c1_46, %c0_47, %c0_48], %65 {strides = array<i32>} : memref<1x2x16x64xf32, #tpu.memory_space<vmem>>, vector<1x1x16x32xf32>,
    %c0_49 = arith.constant 0 : index
    %c1_50 = arith.constant 1 : index
    %c0_51 = arith.constant 0 : index
    %c32_52 = arith.constant 32 : index
    %66 = vector.load %arg4[%c0_49, %c1_50, %c0_51, %c32_52] : memref<1x2x16x64xf32, #tpu.memory_space<vmem>>, vector<1x1x16x32xf32>
    %67 = vector.shape_cast %66 : vector<1x1x16x32xf32> to vector<16x32xf32>
    %68 = vector.shape_cast %62 : vector<16x32xf32> to vector<1x1x16x32xf32>
    tpu.vector_store %arg4[%c0_49, %c1_50, %c0_51, %c32_52], %68 {strides = array<i32>} : memref<1x2x16x64xf32, #tpu.memory_space<vmem>>, vector<1x1x16x32xf32>,
    return
  }
  func.func @transform_0(%arg0: i32, %arg1: i32, %arg2: i32) -> (i32, i32, i32, i32) {
    %c0_i32 = arith.constant 0 : i32
    %c0_i32_0 = arith.constant 0 : i32
    return %arg0, %arg1, %arg2, %c0_i32 : i32, i32, i32, i32
  }
  func.func @transform_1(%arg0: i32, %arg1: i32, %arg2: i32) -> (i32, i32, i32, i32) {
    %c0_i32 = arith.constant 0 : i32
    %c0_i32_0 = arith.constant 0 : i32
    return %arg0, %arg1, %arg2, %c0_i32 : i32, i32, i32, i32
  }
}

</mosaic_0001>

<bundles_post_ra>
// kernel: tpu_custom_call.1
= control target key start
LH: loop header
LB: loop body
LE: loop exit
PB: predicated region body
PF: predicated region fallthrough
CT: control target
= control target key end

     0   :  { %6 = vsyncpa [#allocation3], 0  ;;  %s1653_s0 = inlined_call_operand.hbm [shape: f32[2,8,16,16], index: 0, kind: input, shape index: {}]   ;;  %s1654_s1 = inlined_call_operand.hbm [shape: f32[2,2,16,64], index: 1, kind: output, shape index: {}]  }
   0x1   :  { %8 = vsyncpa [#allocation3 + $0x1], 0 }
   0x2   :  { %9 = vsyncpa [#allocation4], 0 }
   0x3   :  { %11 = vsyncpa [#allocation4 + $0x1], 0  ;;  %s1411_s6 = smov 0   ;;  %s1413_s7 = smov 0  }
   0x4   :  { %s1415_s8 = smov 0   ;;  %s1417_s9 = smov 0  }
   0x5   :  { %s1419_s10 = smov 0   ;;  %s1421_s11 = smov 0  }
   0x6 LB: > { %s1022_s12 = sadd.s32 4294967295, %s1390_s11   ;;  %s1023_s13 = sadd.s32 4294967294, %s1390_s11   ;;  %s1390_s11 = sphi %s1421_s11, %s17_s11   ;;  %s1386_s10 = sphi %s1419_s10, %s1673_s10   ;;  %s1382_s9 = sphi %s1417_s9, %s1672_s9   ;;  %s1378_s8 = sphi %s1415_s8, %s1671_s8   ;;  %s1374_s7 = sphi %s1413_s7, %s1670_s7   ;;  %s1370_s6 = sphi %s1411_s6, %s1669_s6  }
   0x7   : > { %s36_s14 = sadd.s32 1, %s1386_s10  ;;  %s47_s15 = sadd.s32 1, %s1378_s8 }
   0x8   : > { %p38_p0 = scmp.ge.s32.totalorder %s36_s14, 2  ;;  %p54_p1 = scmp.ne.s32.totalorder %s1378_s8, %s1374_s7 }
   0x9   : > { %p55_p2 = scmp.eq.s32.totalorder %s1390_s11, 0  ;;  %p60_p3 = scmp.ne.s32.totalorder %s1374_s7, %s1370_s6 }
   0xa   : > { %s1675_s14 = smov (%p38_p0, %s36_s14), 0  ;;  %p61_p5 = scmp.eq.s32.totalorder %s1022_s12, 0 }
   0xb   : > { %p1452_p4 = por %p55_p2, %p54_p1  ;;  %s40_s17 = ssub.s32 %s1386_s10, %s1675_s14 }
   0xc   : > { %p88_p6 = scmp.eq.s32.totalorder %s1022_s12, 1  ;;  %p45_p7 = scmp.eq.s32.totalorder %s40_s17, 0 }
   0xd   : > { %p1458_p8 = por %p61_p5, %p60_p3  ;;  %p94_p10 = scmp.eq.s32.totalorder %s1023_s13, 1 }
   0xe   : > { %p1462_p9 = por %p88_p6, %p54_p1  ;;  %p1221_p13 = scmp.lt.s32.totalorder %s1390_s11, 2 }
   0xf   : > { %s1467_s20 = scalar_select %p45_p7, %s1378_s8, %s47_s15  }
  0x10   : > { %s1658_s19 = scalar_select %p1462_p9, 1, 0 }
  0x11   : > { %p1469_p11 = por %p94_p10, %p60_p3  ;;  %s114_s22 = sand.u32 1, %s1378_s8  }
  0x12   : > { %s1026_s23 = sshll.u32 %s114_s22, 7  ;;  %s1079_s24 = sshll.u32 %s1386_s10, 11 }
  0x13   : > { %s1659_s21 = scalar_select %p1469_p11, 1, 0 }
  0x14   : > { %s1480_s27 = scalar_lea.hbm %s1653_s0, %s1079_s24  ;;  %s118_s28 = scalar_lea.vmem [#allocation2], %s1026_s23 }
  0x15   : > { %s130_s29 = sshll.u32 %s118_s28, 4  ;;  %p1486_p0 = pnand %p1221_p13, %p1452_p4  ;;  %s1482_s29 = int_to_ptr.vmem [resolvable:$true] %s130_s29 }
  0x16   : > { %s1491_s2 = scalar_lea.sflag [#allocation3], %s114_s22  ;;  %s1278_s3 = scalar_lea.hbm %s1480_s27, 2048 }
  0x17   : > { %p1279_p2 = scmp.ne.s32.totalorder %s1480_s27, %s1278_s3  ;;  %p1280_p3 = pneg %p1486_p0 }
  0x18   : > { %s1283_s12 = scalar_lea.hbm %s1653_s0, 4096  ;;  %p1284_p4 = scmp.lt.u32.totalorder %s1480_s27, %s1653_s0 }
  0x19   : > { %p1281_p5 = pnand %p1280_p3, %p1279_p2  ;;  %p1285_p7 = scmp.lt.u32.totalorder %s1283_s12, %s1278_s3 }
  0x1a   : > { %p1287_p13 = scmp.lt.u32.totalorder %s1278_s3, %s1480_s27 }
  0x1b   : > { %p1282_p6 = pneg %p1281_p5  ;;  %p1286_p10 = por %p1285_p7, %p1284_p4 }
  0x1d   : > { %p1288_p12 = por %p1287_p13, %p1286_p10 }
  0x1f   : > { %p1289_p1 = pnand %p1288_p12, %p1282_p6 }
  0x21   : > { %1292 = shalt.err (!%p1289_p1)
}
  0x22   : > { %s1293_s16 = scalar_lea.vmem %s1482_s29, 2048  ;;  %s1392_s17 = smov [#allocation2]  }
  0x23   : > { %p1294_p2 = scmp.ne.s32.totalorder %s1482_s29, %s1293_s16  ;;  %s1298_s22 = sshll.u32 %s1392_s17, 4  ;;  %s1299_s22 = int_to_ptr.vmem [resolvable:$false] %s1298_s22 }
  0x24   : > { %s1300_s23 = scalar_lea.vmem %s1299_s22, 4096  ;;  %p1301_p9 = scmp.lt.s32.totalorder %s1482_s29, %s1299_s22 }
  0x25   : > { %p1296_p5 = pnand %p1294_p2, %p1280_p3  ;;  %p1302_p4 = scmp.lt.s32.totalorder %s1300_s23, %s1293_s16 }
  0x27   : > { %p1297_p11 = pneg %p1296_p5  ;;  %p1303_p7 = por %p1302_p4, %p1301_p9 }
  0x29   : > { %p1304_p10 = pnand %p1303_p7, %p1297_p11 }
  0x2b   : > { %1307 = shalt.err (!%p1304_p10)
}
  0x2c   : > { %s1393_s24 = smov 128   ;;  %s1394_s25 = smov 8  }
  0x2d   : > { %1216 = dma.hbm_to_vmem [thread:$0]  (!%p1486_p0), %s1480_s27, 2048, %s1482_s29, %s1491_s2, %s1393_s24, %s1393_s24, %s1394_s25  }
  0x2e   : > { %p138_p12 = scmp.lt.s32.totalorder %s1390_s11, 3  ;;  %p1661_p1 = scmp.ge.s32.totalorder %s1390_s11, 1 }
  0x30   : > { %p139_p3 = pnand %p1661_p1, %p138_p12 }
  0x31   : > { %s1523_s26 = sand.u32 (!%p139_p3), 1, %s1374_s7  }
  0x32   : > { %142 = sbr.rel (%p139_p3) target bundleno = 445 (0x1bd), region = 24  ;;  %s1030_s28 = sshll.u32 (!%p139_p3), %s1523_s26, 7 }
  0x33   : > { %s145_s3 = scalar_lea.sflag (!%p139_p3), [#allocation3], %s1523_s26  ;;  %s1527_s4 = scalar_lea.vmem (!%p139_p3), [#allocation2], %s1030_s28 }
  0x39   : > { %1361 = dma.done.wait (%p1458_p8), %s145_s3, 2048  }
  0x3a   : > { %1363 = vsyncadd (%p1458_p8), %s145_s3, 4294965248  ;;  %v171_v0 = vlaneseq  ;;  %v1395_v8 = vmov 0.0   ;;  %v1034_v10 = vld [vmem:[%s1527_s4 + $0x20] sm:$0xff]  ;;  %v1036_v11 = vld [vmem:[%s1527_s4 + $0x30] sm:$0xff]  ;;  %vm213_vm1 = vcmask 130048   ;;  %s1031_s18 = sshll.u32 %s1523_s26, 5 }
  0x3b   : > { %v211_v13 = vsub.f32 %v1034_v10, %v1036_v11  ;;  %v209_v17 = vadd.f32 %v1036_v11, %v1034_v10  ;;  %v1035_v20 = vld [vmem:[%s1527_s4 + $0x28] sm:$0xff]  ;;  %v1037_v21 = vld [vmem:[%s1527_s4 + $0x38] sm:$0xff]  ;;  %v194_v23 = vld [vmem:[%s1527_s4] sm:$0xff]  ;;  %v1396_v29 = vmov 0.5|0.5   ;;  %vm538_vm8 = vcmask 261120  }
  0x3c   : > { %v172_v1 = vshrl.u32 %v171_v0, 7  ;;  %v175_v2 = vand.u32 127, %v171_v0  ;;  %v1032_v24 = vld [vmem:[%s1527_s4 + $0x10] sm:$0xff]  ;;  %v212_v26 = vsub.f32 %v1035_v20, %v1037_v21  ;;  %v210_v27 = vadd.f32 %v1037_v21, %v1035_v20  ;;  %v195_v31 = vld [vmem:[%s1527_s4 + $0x8] sm:$0xff]  ;;  %v1033_v32 = vld [vmem:[%s1527_s4 + $0x18] sm:$0xff]  ;;  %s166_s27 = scalar_lea.vmem [#allocation5], %s1031_s18 }
  0x3d   : > { %1124 = vmatprep.mubr.msk.f32.mxu1 %vm213_vm1, %v211_v13  ;;  %1117 = vmatprep.mubr.msk.f32.mxu0 %vm213_vm1, %v209_v17  ;;  %v207_v28 = vsub.f32 %v194_v23, %v1032_v24  ;;  %v205_v30 = vadd.f32 %v1032_v24, %v194_v23  ;;  %v1054_v33 = vld [vmem:[%s1527_s4 + $0x60] sm:$0xff]  ;;  %v1056_v34 = vld [vmem:[%s1527_s4 + $0x70] sm:$0xff]  ;;  %v208_v35 = vsub.f32 %v195_v31, %v1033_v32  ;;  %v1055_v38 = vld [vmem:[%s1527_s4 + $0x68] sm:$0xff]  ;;  %s1397_s29 = smov 32   ;;  %vm549_vm9 = vcmask 523520   ;;  %s1080_s30 = sshll.u32 %s1382_s9, 9 }
  0x3e   : > { %v173_v3 = vadd.s32 8, %v172_v1  ;;  %v176_v4 = vmul.u32 2, %v172_v1  ;;  %v206_v36 = vadd.f32 %v1033_v32, %v195_v31  ;;  %v570_v37 = vsub.f32 %v1054_v33, %v1056_v34  ;;  %v1057_v39 = vld [vmem:[%s1527_s4 + $0x78] sm:$0xff]  ;;  %v1050_v40 = vld [vmem:[%s1527_s4 + $0x40] sm:$0xff]  ;;  %v1052_v41 = vld [vmem:[%s1527_s4 + $0x50] sm:$0xff]  ;;  %s928_s2 = sshll.u32 %s166_s27, 4  ;;  %s1602_s13 = scalar_lea.hbm %s1654_s1, %s1080_s30  ;;  %s1604_s2 = int_to_ptr.vmem [resolvable:$true] %s928_s2 }
  0x3f   : > { %v568_v42 = vadd.f32 %v1056_v34, %v1054_v33  ;;  %v571_v43 = vsub.f32 %v1055_v38, %v1057_v39  ;;  %v566_v44 = vsub.f32 %v1050_v40, %v1052_v41  ;;  %v569_v45 = vadd.f32 %v1057_v39, %v1055_v38  ;;  %v1051_v47 = vld [vmem:[%s1527_s4 + $0x48] sm:$0xff]  ;;  %v1053_v48 = vld [vmem:[%s1527_s4 + $0x58] sm:$0xff]  ;;  %s910_s15 = scalar_lea.sflag [#allocation4], %s1523_s26  ;;  %s1308_s16 = scalar_lea.vmem %s1604_s2, 512 }
  0x40   : > { %v177_v5 = vmul.u32 2, %v173_v3  ;;  %vm1533_vm0 = vcmp.eq.s32.totalorder %v175_v2, %v176_v4  ;;  %v180_v7 = vadd.s32 1, %v176_v4  ;;  %v564_v46 = vadd.f32 %v1052_v41, %v1050_v40  ;;  %p1309_p8 = scmp.ne.s32.totalorder %s1604_s2, %s1308_s16  ;;  %p1666_p9 = scmp.ne.s32.totalorder %s1658_s19, 0 }
  0x41   : > { %v188_v9 = vsel %vm1533_vm0, 0.5, %v1395_v8  ;;  %v567_v49 = vsub.f32 %v1051_v47, %v1053_v48  ;;  %v565_v50 = vadd.f32 %v1053_v48, %v1051_v47  ;;  %s1398_s9 = smov [#allocation5]  }
  0x42   : > { %vm179_vm2 = vcmp.eq.s32.totalorder %v175_v2, %v177_v5  ;;  %v181_v12 = vadd.s32 1, %v177_v5  ;;  %vm182_vm3 = vcmp.eq.s32.totalorder %v175_v2, %v180_v7  ;;  %p1310_p11 = pnand %p1309_p8, %p1666_p9  ;;  %s1312_s17 = sshll.u32 %s1398_s9, 4  ;;  %s1313_s17 = int_to_ptr.vmem [resolvable:$false] %s1312_s17 }
  0x43   : > { %v189_v14 = vsel %vm179_vm2, 0.5, %v1395_v8  ;;  %v190_v15 = vsel %vm182_vm3, 0.5, %v1395_v8  ;;  %vm184_vm5 = vmor %vm1533_vm0, %vm182_vm3  ;;  %s1314_s22 = scalar_lea.vmem %s1313_s17, 1024  ;;  %p1315_p6 = scmp.lt.s32.totalorder %s1604_s2, %s1313_s17 }
  0x44   : > { %vm183_vm4 = vcmp.eq.s32.totalorder %v175_v2, %v181_v12  ;;  %v192_v16 = vsub.f32 %v188_v9, %v190_v15  ;;  %p1311_p0 = pneg %p1310_p11  ;;  %p1316_p13 = scmp.lt.s32.totalorder %s1314_s22, %s1308_s16 }
  0x45   : > { %v191_v18 = vsel %vm183_vm4, 0.5, %v1395_v8  ;;  %vm185_vm6 = vmor %vm179_vm2, %vm183_vm4 }
  0x46   : > { %v193_v19 = vsub.f32 %v189_v14, %v191_v18  ;;  %vm1549_vm7 = vmpackc.low %vm185_vm6, %vm184_vm5  ;;  %p1317_p2 = por %p1316_p13, %p1315_p6 }
  0x48   : > { %v1169_v22 = vpack.c.bf16 %v193_v19, %v192_v16  ;;  %p1318_p5 = pnand %p1317_p2, %p1311_p0 }
  0x4a   : > { %1174 = vmatprep.subr.bf16.mxu1 %v1169_v22  ;;  %1170 = vmatprep.subr.bf16.mxu0 %v1169_v22 }
  0x4b   : > { %1176 = vmatpush3.bf16.msra.mxu1 %v1169_v22  ;;  %1172 = vmatpush3.bf16.msra.mxu0 %v1169_v22 }
  0x4c   : > { %1182 = vmatprep.subr.msk.bf16.mxu1 %vm1549_vm7, %v1396_v29  ;;  %1178 = vmatprep.subr.msk.bf16.mxu0 %vm1549_vm7, %v1396_v29 }
  0x4e   : > { %1125 = vmatmul.mubr.msk.f32.vlgmr.msra.gmra.mrb[0].mxu1 %vm213_vm1, %v212_v26  ;;  %1118 = vmatmul.mubr.msk.f32.vlgmr.msra.gmra.mrb[0].mxu0 %vm213_vm1, %v210_v27 }
  0x4f   : > { %1184 = vmatpush3.bf16.msk.msra.mxu1 %vm1549_vm7, %v1396_v29  ;;  %1138 = vmatprep.mubr.msk.f32.mxu1 %vm213_vm1, %v207_v28 }
  0x50   : > { %1190 = vmatprep.subr.bf16.mxu1 %v1169_v22  ;;  %1180 = vmatpush3.bf16.msk.msra.mxu0 %vm1549_vm7, %v1396_v29 }
  0x51   : > { %1131 = vmatprep.mubr.msk.f32.mxu0 %vm213_vm1, %v205_v30  ;;  %1186 = vmatprep.subr.bf16.mxu0 %v1169_v22 }
  0x56   : > { %1139 = vmatmul.mubr.msk.f32.vlgmr.msra.gmra.mrb[0].mxu1 %vm213_vm1, %v208_v35  ;;  %1132 = vmatmul.mubr.msk.f32.vlgmr.msra.gmra.mrb[0].mxu0 %vm213_vm1, %v206_v36 }
  0x57   : > { %1192 = vmatpush3.bf16.msra.mxu1 %v1169_v22  ;;  %1152 = vmatprep.mubr.msk.f32.mxu1 %vm213_vm1, %v570_v37 }
  0x58   : > { %1198 = vmatprep.subr.msk.bf16.mxu1 %vm1549_vm7, %v1396_v29  ;;  %1188 = vmatpush3.bf16.msra.mxu0 %v1169_v22 }
  0x59   : > { %1145 = vmatprep.mubr.msk.f32.mxu0 %vm213_vm1, %v568_v42  ;;  %1194 = vmatprep.subr.msk.bf16.mxu0 %vm1549_vm7, %v1396_v29 }
  0x5a   : > { %1153 = vmatmul.mubr.msk.f32.vlgmr.msra.gmra.mrb[2].mxu1 %vm213_vm1, %v571_v43 }
  0x5b   : > { %1200 = vmatpush3.bf16.msk.msra.mxu1 %vm1549_vm7, %v1396_v29  ;;  %1166 = vmatprep.mubr.msk.f32.mxu1 %vm213_vm1, %v566_v44 }
  0x5c   : > { %1146 = vmatmul.mubr.msk.f32.vlgmr.msra.gmra.mrb[2].mxu0 %vm213_vm1, %v569_v45 }
  0x5d   : > { %1196 = vmatpush3.bf16.msk.msra.mxu0 %vm1549_vm7, %v1396_v29  ;;  %1159 = vmatprep.mubr.msk.f32.mxu0 %vm213_vm1, %v564_v46 }
  0x62   : > { %1167 = vmatmul.mubr.msk.f32.vlgmr.msra.gmra.mrb[2].mxu1 %vm213_vm1, %v567_v49 }
  0x64   : > { %1160 = vmatmul.mubr.msk.f32.vlgmr.msra.gmra.mrb[2].mxu0 %vm213_vm1, %v565_v50 }
 0x129   : > { %v1140_v51 = vpop.f32.mrb[0].mxu1  ;;  %v1133_v52 = vpop.f32.mrb[0].mxu0 }
 0x12a   : > { %v529_v53 = vpop.f32.mrb[1].mxu1  ;;  %540 = vst.msk [vmem:[%s166_s27 + $0x8] sm:$0xff] %vm538_vm8, %v1133_v52  ;;  %v448_v54 = vpop.f32.mrb[1].mxu0 }
 0x12b   : > { %543 = vrot.lane.b32.xlu0 %v529_v53, %s1397_s29  ;;  %539 = vst.msk [vmem:[%s166_s27] sm:$0xff] %vm538_vm8, %v448_v54 }
 0x12f   : > { %545 = vrot.lane.b32.xlu0 %v1140_v51, %s1397_s29 }
 0x135   : > { %v1168_v55 = vpop.f32.mrb[2].mxu1 }
 0x136   : > { %v887_v56 = vpop.f32.mrb[3].mxu1 }
 0x137   : > { %901 = vrot.lane.b32.xlu1 %v887_v56, %s1397_s29  ;;  %v1161_v57 = vpop.f32.mrb[2].mxu0 }
 0x138   : > { %1071 = vst.msk [vmem:[%s166_s27 + $0x18] sm:$0xff] %vm538_vm8, %v1161_v57  ;;  %v806_v58 = vpop.f32.mrb[3].mxu0 }
 0x139   : > { %1070 = vst.msk [vmem:[%s166_s27 + $0x10] sm:$0xff] %vm538_vm8, %v806_v58 }
 0x13b   : > { %903 = vrot.lane.b32.xlu1 %v1168_v55, %s1397_s29 }
 0x19d   : > { %v544_v59 = vpop.permute.xlu0 %543 }
 0x19e   : > { %550 = vst.msk [vmem:[%s166_s27] sm:$0xff] %vm549_vm9, %v544_v59 }
 0x1a1   : > { %v546_v60 = vpop.permute.xlu0 %545 }
 0x1a2   : > { %551 = vst.msk [vmem:[%s166_s27 + $0x8] sm:$0xff] %vm549_vm9, %v546_v60 }
 0x1a9   : > { %v902_v61 = vpop.permute.xlu1 %901 }
 0x1aa   : > { %1072 = vst.msk [vmem:[%s166_s27 + $0x10] sm:$0xff] %vm549_vm9, %v902_v61 }
 0x1ad   : > { %v904_v62 = vpop.permute.xlu1 %903 }
 0x1ae   : > { %1073 = vst.msk [vmem:[%s166_s27 + $0x18] sm:$0xff] %vm549_vm9, %v904_v62 }
 0x1af   : > { %1321 = shalt.err (!%p1318_p5)
}
 0x1b0   : > { %s1322_s23 = scalar_lea.hbm %s1602_s13, 512  ;;  %s1326_s28 = scalar_lea.hbm %s1654_s1, 1024 }
 0x1b1   : > { %p1323_p4 = scmp.ne.s32.totalorder %s1602_s13, %s1322_s23  ;;  %p1327_p12 = scmp.lt.u32.totalorder %s1602_s13, %s1654_s1 }
 0x1b2   : > { %p1328_p1 = scmp.lt.u32.totalorder %s1326_s28, %s1322_s23  ;;  %p1330_p8 = scmp.lt.u32.totalorder %s1322_s23, %s1602_s13 }
 0x1b3   : > { %p1324_p7 = pnand %p1323_p4, %p1666_p9 }
 0x1b4   : > { %p1329_p3 = por %p1328_p1, %p1327_p12 }
 0x1b5   : > { %p1325_p10 = pneg %p1324_p7 }
 0x1b6   : > { %p1331_p11 = por %p1330_p8, %p1329_p3 }
 0x1b8   : > { %p1332_p0 = pnand %p1331_p11, %p1325_p10 }
 0x1ba   : > { %1335 = shalt.err (!%p1332_p0)
}
 0x1bb   : > { %s1399_s18 = smov 128   ;;  %s1400_s27 = smov 8  }
 0x1bc   : > { %1211 = dma.vmem_to_hbm [thread:$0]  (%p1666_p9), %s1604_s2, 512, %s1602_s13, %s910_s15, %s1399_s18, %s1399_s18, %s1400_s27  }
 0x1bd PF: > { %s943_s29 = sand.u32 1, %s1370_s6   ;;  %p1667_p6 = scmp.ne.s32.totalorder %s1659_s21, 0 }
 0x1be   : > { %p1668_p13 = scmp.ge.s32.totalorder %s1390_s11, 2  ;;  %s944_s30 = scalar_lea.sflag [#allocation4], %s943_s29 }
 0x1c0   : > { %p1218_p2 = pnand %p1668_p13, %p1667_p6 }
 0x1c2   : > { %1365 = dma.done.wait (!%p1218_p2), %s944_s30, 512  }
 0x1c3   : > { %1367 = vsyncadd (!%p1218_p2), %s944_s30, 4294966784  ;;  %s17_s11 = sadd.s32 1, %s1390_s11   ;;  %s1669_s6 = smov %s1374_s7 }
 0x1c4   : > { %p14_p5 = scmp.ge.s32.totalorder %s17_s11, 4   ;;  %s1670_s7 = smov %s1378_s8 }
 0x1c5   : > { %s1671_s8 = smov %s1467_s20  ;;  %s1672_s9 = smov %s1386_s10 }
 0x1c6   : > { %s1673_s10 = smov %s1675_s14  ;;  %16 = sbr.rel (!%p14_p5) target bundleno = 6 (0x6), region = 77 }
 0x1cd   :  { %949 = vsyncpa [#allocation3], 1 }
 0x1ce   :  { %951 = vsyncpa [#allocation3 + $0x1], 1 }
 0x1cf   :  { %952 = vsyncpa [#allocation4], 1 }
 0x1d0   :  { %954 = vsyncpa [#allocation4 + $0x1], 1 }

</bundles_post_ra>
